<compile_context>
chip_gen: v5e
topology: v5e:2x2
jax: 0.10.0
libtpu: 0.0.40
codegen_flags: <defaults>
</compile_context>

<pallas_src>
import math

import jax
import jax.numpy as jnp
from jax.experimental import pallas as pl
from jax.experimental.pallas import tpu as pltpu


def _round_up(x, m):
    return (x + m - 1) // m * m


# ---------------------------------------------------------------------------
# Kernel
# ---------------------------------------------------------------------------
def oned_block_kernel(x_ref, w1_ref, t1_ref, w2_ref, t2_ref, o_ref):
    """x_ref: (B_blk, Cin_p, L_pad); w*: (Cout_p, 3*Cin_p); t*: (Cout_p, 1);
    o_ref: (B_blk, Cout, L) -- the true (unpadded) output window."""
    b_blk, _, l_pad = x_ref.shape
    cout, l_true = o_ref.shape[1], o_ref.shape[2]

    # Boundary masks for the zero-padded 3-tap conv.  Built ONCE per grid step
    # (JAX does not CSE broadcast/iota) and reused by both layers / all samples.
    col = jax.lax.broadcasted_iota(jnp.int32, (1, l_pad), 1)
    has_left = col >= 1                  # position l has a valid left neighbour
    has_right = col <= l_true - 2        # position l has a valid right neighbour

    # Load folded weights / shifts once per grid step (reused by all samples & layers).
    w1 = w1_ref[...]
    t1 = t1_ref[...]
    w2 = w2_ref[...]
    t2 = t2_ref[...]

    def conv3_affine_relu(x, w, t):
        # x: (C, L_pad).  out[:, l] = W @ [x[:, l-1]; x[:, l]; x[:, l+1]] + shift; ReLU.
        x_prev = jnp.where(has_left, pltpu.roll(x, shift=1, axis=1), 0.0)
        x_next = jnp.where(has_right, pltpu.roll(x, shift=l_pad - 1, axis=1), 0.0)
        x_cat = jnp.concatenate([x_prev, x, x_next], axis=0)         # (3C, L_pad)
        acc = jnp.dot(w, x_cat, preferred_element_type=jnp.float32)  # MXU
        return jnp.maximum(acc + t, 0.0)                             # (Cout_p, L_pad)

    for b in range(b_blk):  # static unroll over the (small) per-step sample block
        h = conv3_affine_relu(x_ref[b], w1, t1)
        h = conv3_affine_relu(h, w2, t2)
        o_ref[b] = h[:cout, :l_true].astype(o_ref.dtype)             # drop pad rows/lanes


# ---------------------------------------------------------------------------
# Wrapper
# ---------------------------------------------------------------------------
def oned_block(x_ncl, kparams, *, block_samples=8):
    """x_ncl: (N, Cin, L) float32 in PyTorch Conv1d layout.  Returns (N, Cout, L)."""
    N, Cin, L = x_ncl.shape
    assert Cin == kparams["cin"], (Cin, kparams["cin"])
    Cout = kparams["cout"]
    cout_p = kparams["w1"].shape[0]
    cin_p = kparams["w1"].shape[1] // 3
    L_pad = _round_up(L, 128)                       # lane-aligned spatial length

    # Samples per grid step: large enough to amortize per-step overhead, but keep
    # at least 2 grid steps so a megacore chip can split the batch axis.
    b_blk = max(1, min(block_samples, -(-N // 2)))
    N_pad = _round_up(N, b_blk)

    if (N_pad, cin_p, L_pad) != (N, Cin, L):
        x_ncl = jnp.pad(x_ncl, ((0, N_pad - N), (0, cin_p - Cin), (0, L_pad - L)))

    def bcast(shape):
        nd = len(shape)
        return pl.BlockSpec(shape, lambda n, _nd=nd: (0,) * _nd)

    out = pl.pallas_call(
        oned_block_kernel,
        out_shape=jax.ShapeDtypeStruct((N_pad, Cout, L), jnp.float32),
        grid=(N_pad // b_blk,),
        in_specs=[
            pl.BlockSpec((b_blk, cin_p, L_pad), lambda n: (n, 0, 0)),  # activations
            bcast(kparams["w1"].shape),                                # folded w1
            bcast(kparams["t1"].shape),                                # folded shift1
            bcast(kparams["w2"].shape),                                # folded w2
            bcast(kparams["t2"].shape),                                # folded shift2
        ],
        out_specs=pl.BlockSpec((b_blk, Cout, L), lambda n: (n, 0, 0)),
        compiler_params=pltpu.CompilerParams(dimension_semantics=("parallel",)),
    )(x_ncl, kparams["w1"], kparams["t1"], kparams["w2"], kparams["t2"])
    return out[:N] if N_pad != N else out


# ---------------------------------------------------------------------------
# Params: PyTorch-equivalent init + fold (conv bias + eval-mode BN -> weights/shift)
# ---------------------------------------------------------------------------
def init_raw_params(key, indim, outdim):
    """Deterministic params matching the block's __init__ + init_1Dlayer (PyTorch layouts)."""
    k1, k2, k3, k4 = jax.random.split(key, 4)
    std = math.sqrt(2.0 / float(3 * outdim))             # init_1Dlayer for Conv1d
    w1 = jax.random.normal(k1, (outdim, indim, 3), jnp.float32) * std   # (O, I, K)
    w2 = jax.random.normal(k2, (outdim, outdim, 3), jnp.float32) * std
    bound1 = 1.0 / math.sqrt(indim * 3)                  # PyTorch default bias init
    bound2 = 1.0 / math.sqrt(outdim * 3)
    b1 = jax.random.uniform(k3, (outdim,), jnp.float32, -bound1, bound1)
    b2 = jax.random.uniform(k4, (outdim,), jnp.float32, -bound2, bound2)
    # BN1d after init_1Dlayer: weight=1, bias=0, running_mean=0, running_var=1.
    return {
        "w1": w1, "b1": b1, "w2": w2, "b2": b2,
        "gamma": jnp.ones((outdim,), jnp.float32),
        "beta": jnp.zeros((outdim,), jnp.float32),
        "rmean": jnp.zeros((outdim,), jnp.float32),
        "rvar": jnp.ones((outdim,), jnp.float32),
    }


def _fold_conv_bn(w_oik, bias, gamma, beta, rmean, rvar, eps, cin_p, cout_p):
    """Fold Conv1d bias + eval-mode BN into (Cout_p, 3*Cin_p) weight + (Cout_p, 1) shift."""
    cout, cin, _ = w_oik.shape
    s = gamma / jnp.sqrt(rvar + eps)                     # BN scale
    t = beta - rmean * s                                 # BN shift
    w_t = jnp.transpose(w_oik, (0, 2, 1))                # (Cout, 3, Cin): tap-major
    w_t = jnp.pad(w_t, ((0, cout_p - cout), (0, 0), (0, cin_p - cin)))
    w_cat = w_t.reshape(cout_p, 3 * cin_p)               # [tap0 | tap1 | tap2] blocks
    s_p = jnp.pad(s, (0, cout_p - cout))
    shift = jnp.pad(bias * s + t, (0, cout_p - cout))
    return w_cat * s_p[:, None], shift[:, None]


def fold_params(raw, eps=1e-5):
    cout, cin, _ = raw["w1"].shape
    cin_p, cout_p = _round_up(cin, 8), _round_up(cout, 8)
    w1, t1 = _fold_conv_bn(raw["w1"], raw["b1"], raw["gamma"], raw["beta"],
                           raw["rmean"], raw["rvar"], eps, cin_p, cout_p)
    w2, t2 = _fold_conv_bn(raw["w2"], raw["b2"], raw["gamma"], raw["beta"],
                           raw["rmean"], raw["rvar"], eps, cout_p, cout_p)
    return {"w1": w1, "t1": t1, "w2": w2, "t2": t2, "cin": cin, "cout": cout}


# ---------------------------------------------------------------------------
# Pure-JAX reference (from the RAW params, so it also validates the folding)
# ---------------------------------------------------------------------------
def ref_forward(x_ncl, raw, eps=1e-5):
    s = raw["gamma"] / jnp.sqrt(raw["rvar"] + eps)
    t = raw["beta"] - raw["rmean"] * s

    def conv_bn_relu(x, w, b):
        N, C, L = x.shape
        xp = jnp.pad(x, ((0, 0), (0, 0), (1, 1)))
        y = (jnp.einsum("ncl,oc->nol", xp[:, :, 0:L], w[:, :, 0]) +
             jnp.einsum("ncl,oc->nol", xp[:, :, 1:L + 1], w[:, :, 1]) +
             jnp.einsum("ncl,oc->nol", xp[:, :, 2:L + 2], w[:, :, 2]))
        y = y + b[None, :, None]
        y = y * s[None, :, None] + t[None, :, None]
        return jnp.maximum(y, 0.0)

    h = conv_bn_relu(x_ncl, raw["w1"], raw["b1"])
    return conv_bn_relu(h, raw["w2"], raw["b2"])


if __name__ == "__main__":
    key = jax.random.PRNGKey(0)
    kx, kp = jax.random.split(key)

    N, Cin, Cout, L = 2, 4, 8, 16                        # small test shapes
    x = jax.random.normal(kx, (N, Cin, L), jnp.float32)  # PyTorch NCL input

    raw = init_raw_params(kp, Cin, Cout)
    kparams = fold_params(raw)

    y = oned_block(x, kparams)
    jax.block_until_ready(y)

    y_ref = ref_forward(x, raw)
    assert y.shape == (N, Cout, L), y.shape
    err = float(jnp.abs(y - y_ref).max())
    assert jnp.allclose(y, y_ref, atol=1e-3, rtol=1e-3), err

    print("KERNEL_OK")
</pallas_src>

<mosaic_0001>
module attributes {stable_mosaic.version = 11 : i64} {
  func.func @oned_block_kernel(%arg0: i32, %arg1: memref<1x8x128xf32, #tpu.memory_space<vmem>>, %arg2: memref<8x24xf32, #tpu.memory_space<vmem>>, %arg3: memref<8x1xf32, #tpu.memory_space<vmem>>, %arg4: memref<8x24xf32, #tpu.memory_space<vmem>>, %arg5: memref<8x1xf32, #tpu.memory_space<vmem>>, %arg6: memref<1x8x16xf32, #tpu.memory_space<vmem>>) attributes {dimension_semantics = [#tpu.dimension_semantics<parallel>], iteration_bounds = array<i64: 2>, scalar_prefetch = 0 : i64, scratch_operands = 0 : i64, tpu.core_type = #tpu.core_type<tc>, window_params = [{transform_indices = @transform_0, window_bounds = array<i64: 1, 8, 128>}, {pipeline_mode = #tpu.pipeline_mode<synchronous>, transform_indices = @transform_1, window_bounds = array<i64: 8, 24>}, {pipeline_mode = #tpu.pipeline_mode<synchronous>, transform_indices = @transform_2, window_bounds = array<i64: 8, 1>}, {pipeline_mode = #tpu.pipeline_mode<synchronous>, transform_indices = @transform_3, window_bounds = array<i64: 8, 24>}, {pipeline_mode = #tpu.pipeline_mode<synchronous>, transform_indices = @transform_4, window_bounds = array<i64: 8, 1>}, {transform_indices = @transform_5, window_bounds = array<i64: 1, 8, 16>}]} {
    %0 = tpu.iota {dimensions = array<i32: 1>} : vector<1x128xi32>
    %c1_i32 = arith.constant 1 : i32
    %1 = vector.broadcast %c1_i32 : i32 to vector<1x128xi32>
    %2 = arith.cmpi sge, %0, %1 : vector<1x128xi32>
    %c14_i32 = arith.constant 14 : i32
    %3 = vector.broadcast %c14_i32 : i32 to vector<1x128xi32>
    %4 = arith.cmpi sle, %0, %3 : vector<1x128xi32>
    %c0 = arith.constant 0 : index
    %c0_0 = arith.constant 0 : index
    %5 = vector.load %arg2[%c0, %c0_0] : memref<8x24xf32, #tpu.memory_space<vmem>>, vector<8x24xf32>
    %c0_1 = arith.constant 0 : index
    %c0_2 = arith.constant 0 : index
    %6 = vector.load %arg3[%c0_1, %c0_2] : memref<8x1xf32, #tpu.memory_space<vmem>>, vector<8x1xf32>
    %c0_3 = arith.constant 0 : index
    %c0_4 = arith.constant 0 : index
    %7 = vector.load %arg4[%c0_3, %c0_4] : memref<8x24xf32, #tpu.memory_space<vmem>>, vector<8x24xf32>
    %c0_5 = arith.constant 0 : index
    %c0_6 = arith.constant 0 : index
    %8 = vector.load %arg5[%c0_5, %c0_6] : memref<8x1xf32, #tpu.memory_space<vmem>>, vector<8x1xf32>
    %c0_7 = arith.constant 0 : index
    %c0_8 = arith.constant 0 : index
    %c0_9 = arith.constant 0 : index
    %9 = vector.load %arg1[%c0_7, %c0_8, %c0_9] : memref<1x8x128xf32, #tpu.memory_space<vmem>>, vector<1x8x128xf32>
    %10 = vector.shape_cast %9 : vector<1x8x128xf32> to vector<8x128xf32>
    %c1_i32_10 = arith.constant 1 : i32
    %11 = tpu.dynamic_rotate %10 by %c1_i32_10 dim 1 : vector<8x128xf32>, i32 -> vector<8x128xf32>
    %cst = arith.constant 0.000000e+00 : f32
    %12 = vector.shape_cast %2 : vector<1x128xi1> to vector<1x128xi1>
    %13 = vector.broadcast %12 : vector<1x128xi1> to vector<8x128xi1>
    %14 = vector.broadcast %cst : f32 to vector<8x128xf32>
    %15 = arith.select %13, %11, %14 : vector<8x128xi1>, vector<8x128xf32>
    %c127_i32 = arith.constant 127 : i32
    %16 = tpu.dynamic_rotate %10 by %c127_i32 dim 1 : vector<8x128xf32>, i32 -> vector<8x128xf32>
    %cst_11 = arith.constant 0.000000e+00 : f32
    %17 = vector.shape_cast %4 : vector<1x128xi1> to vector<1x128xi1>
    %18 = vector.broadcast %17 : vector<1x128xi1> to vector<8x128xi1>
    %19 = vector.broadcast %cst_11 : f32 to vector<8x128xf32>
    %20 = arith.select %18, %16, %19 : vector<8x128xi1>, vector<8x128xf32>
    %21 = tpu.concatenate %15, %10, %20 in 0 : vector<8x128xf32>, vector<8x128xf32>, vector<8x128xf32> -> vector<24x128xf32>
    %cst_12 = arith.constant dense<0.000000e+00> : vector<8x128xf32>
    %22 = tpu.matmul %5, %21, %cst_12 {dimension_numbers = #tpu.dot_dimension_numbers<[1], [0], [0], [1], [0, 0, 1, 1], [], []>} : vector<8x24xf32>, vector<24x128xf32>, vector<8x128xf32> -> vector<8x128xf32>
    %23 = vector.broadcast %6 : vector<8x1xf32> to vector<8x128xf32>
    %24 = arith.addf %22, %23 : vector<8x128xf32>
    %cst_13 = arith.constant 0.000000e+00 : f32
    %25 = vector.broadcast %cst_13 : f32 to vector<8x128xf32>
    %26 = arith.maximumf %24, %25 : vector<8x128xf32>
    %c1_i32_14 = arith.constant 1 : i32
    %27 = tpu.dynamic_rotate %26 by %c1_i32_14 dim 1 : vector<8x128xf32>, i32 -> vector<8x128xf32>
    %cst_15 = arith.constant 0.000000e+00 : f32
    %28 = vector.shape_cast %2 : vector<1x128xi1> to vector<1x128xi1>
    %29 = vector.broadcast %28 : vector<1x128xi1> to vector<8x128xi1>
    %30 = vector.broadcast %cst_15 : f32 to vector<8x128xf32>
    %31 = arith.select %29, %27, %30 : vector<8x128xi1>, vector<8x128xf32>
    %c127_i32_16 = arith.constant 127 : i32
    %32 = tpu.dynamic_rotate %26 by %c127_i32_16 dim 1 : vector<8x128xf32>, i32 -> vector<8x128xf32>
    %cst_17 = arith.constant 0.000000e+00 : f32
    %33 = vector.shape_cast %4 : vector<1x128xi1> to vector<1x128xi1>
    %34 = vector.broadcast %33 : vector<1x128xi1> to vector<8x128xi1>
    %35 = vector.broadcast %cst_17 : f32 to vector<8x128xf32>
    %36 = arith.select %34, %32, %35 : vector<8x128xi1>, vector<8x128xf32>
    %37 = tpu.concatenate %31, %26, %36 in 0 : vector<8x128xf32>, vector<8x128xf32>, vector<8x128xf32> -> vector<24x128xf32>
    %cst_18 = arith.constant dense<0.000000e+00> : vector<8x128xf32>
    %38 = tpu.matmul %7, %37, %cst_18 {dimension_numbers = #tpu.dot_dimension_numbers<[1], [0], [0], [1], [0, 0, 1, 1], [], []>} : vector<8x24xf32>, vector<24x128xf32>, vector<8x128xf32> -> vector<8x128xf32>
    %39 = vector.broadcast %8 : vector<8x1xf32> to vector<8x128xf32>
    %40 = arith.addf %38, %39 : vector<8x128xf32>
    %cst_19 = arith.constant 0.000000e+00 : f32
    %41 = vector.broadcast %cst_19 : f32 to vector<8x128xf32>
    %42 = arith.maximumf %40, %41 : vector<8x128xf32>
    %43 = vector.extract_strided_slice %42 {offsets = [0, 0], sizes = [8, 16], strides = [1, 1]} : vector<8x128xf32> to vector<8x16xf32>
    %c0_20 = arith.constant 0 : index
    %c0_21 = arith.constant 0 : index
    %c0_22 = arith.constant 0 : index
    %44 = vector.load %arg6[%c0_20, %c0_21, %c0_22] : memref<1x8x16xf32, #tpu.memory_space<vmem>>, vector<1x8x16xf32>
    %45 = vector.shape_cast %44 : vector<1x8x16xf32> to vector<8x16xf32>
    %46 = vector.shape_cast %43 : vector<8x16xf32> to vector<1x8x16xf32>
    tpu.vector_store %arg6[%c0_20, %c0_21, %c0_22], %46 {strides = array<i32>} : memref<1x8x16xf32, #tpu.memory_space<vmem>>, vector<1x8x16xf32>,
    return
  }
  func.func @transform_0(%arg0: i32) -> (i32, i32, i32) {
    %c0_i32 = arith.constant 0 : i32
    %c0_i32_0 = arith.constant 0 : i32
    %c0_i32_1 = arith.constant 0 : i32
    return %arg0, %c0_i32, %c0_i32_0 : i32, i32, i32
  }
  func.func @transform_1(%arg0: i32) -> (i32, i32) {
    %c0_i32 = arith.constant 0 : i32
    %c0_i32_0 = arith.constant 0 : i32
    %c0_i32_1 = arith.constant 0 : i32
    return %c0_i32, %c0_i32_0 : i32, i32
  }
  func.func @transform_2(%arg0: i32) -> (i32, i32) {
    %c0_i32 = arith.constant 0 : i32
    %c0_i32_0 = arith.constant 0 : i32
    %c0_i32_1 = arith.constant 0 : i32
    return %c0_i32, %c0_i32_0 : i32, i32
  }
  func.func @transform_3(%arg0: i32) -> (i32, i32) {
    %c0_i32 = arith.constant 0 : i32
    %c0_i32_0 = arith.constant 0 : i32
    %c0_i32_1 = arith.constant 0 : i32
    return %c0_i32, %c0_i32_0 : i32, i32
  }
  func.func @transform_4(%arg0: i32) -> (i32, i32) {
    %c0_i32 = arith.constant 0 : i32
    %c0_i32_0 = arith.constant 0 : i32
    %c0_i32_1 = arith.constant 0 : i32
    return %c0_i32, %c0_i32_0 : i32, i32
  }
  func.func @transform_5(%arg0: i32) -> (i32, i32, i32) {
    %c0_i32 = arith.constant 0 : i32
    %c0_i32_0 = arith.constant 0 : i32
    %c0_i32_1 = arith.constant 0 : i32
    return %arg0, %c0_i32, %c0_i32_0 : i32, i32, i32
  }
}

</mosaic_0001>

<bundles_post_ra>
// kernel: tpu_custom_call.1
= control target key start
LH: loop header
LB: loop body
LE: loop exit
PB: predicated region body
PF: predicated region fallthrough
CT: control target
= control target key end

     0   :  { %10 = vsyncpa [#allocation3], 0  ;;  %s808_s0 = inlined_call_operand.vmem [shape: f32[2,8,128], index: 0, kind: input, shape index: {}]   ;;  %s809_s1 = inlined_call_operand.hbm [shape: f32[8,24], index: 1, kind: input, shape index: {}]   ;;  %s810_s2 = inlined_call_operand.vmem [shape: f32[8,1], index: 2, kind: input, shape index: {}]   ;;  %s811_s3 = inlined_call_operand.hbm [shape: f32[8,24], index: 3, kind: input, shape index: {}]   ;;  %s812_s4 = inlined_call_operand.vmem [shape: f32[8,1], index: 4, kind: input, shape index: {}]   ;;  %s813_s5 = inlined_call_operand.hbm [shape: f32[2,8,16], index: 5, kind: output, shape index: {}]  }
   0x1   :  { %11 = vsyncpa [#allocation6], 0 }
   0x2   :  { %12 = vsyncpa [#allocation4], 0 }
   0x3   :  { %14 = vsyncpa [#allocation4 + $0x1], 0  ;;  %s686_s18 = smov 0   ;;  %s688_s19 = smov 0  }
   0x4   :  { %s690_s20 = smov 0   ;;  %s692_s21 = smov 0  }
   0x5 LB: > { %s707_s22 = sadd.s32 4294967295, %s649_s21   ;;  %s433_s23 = sadd.s32 4294967294, %s649_s21   ;;  %s649_s21 = sphi %s692_s21, %s820_s21   ;;  %s645_s20 = sphi %s690_s20, %s819_s20   ;;  %s641_s19 = sphi %s688_s19, %s818_s19   ;;  %s637_s18 = sphi %s686_s18, %s817_s18  }
   0x6   : > { %s711_s24 = sadd.s32 1, %s649_s21   ;;  %s137_s25 = sadd.s32 1, %s645_s20 }
   0x7   : > { %s134_s26 = ssub.s32 %s649_s21, %s711_s24  ;;  %p147_p0 = scmp.ne.s32.totalorder %s645_s20, %s641_s19 }
   0x8   : > { %p135_p1 = scmp.eq.s32.totalorder %s134_s26, 0  ;;  %p148_p2 = scmp.eq.s32.totalorder %s707_s22, 1 }
   0x9   : > { %p153_p3 = scmp.ne.s32.totalorder %s641_s19, %s637_s18  ;;  %p154_p4 = scmp.eq.s32.totalorder %s433_s23, 1 }
   0xa   : > { %s722_s27 = scalar_select %p135_p1, %s645_s20, %s137_s25  }
   0xb   : > { %p724_p5 = por %p148_p2, %p147_p0  ;;  %p728_p6 = por %p154_p4, %p153_p3 }
   0xc   : > { %p434_p7 = scmp.ge.s32.totalorder %s649_s21, 1  ;;  %p161_p8 = scmp.lt.s32.totalorder %s649_s21, 3 }
   0xd   : > { %p474_p9 = scmp.eq.s32.totalorder %s707_s22, 0  ;;  %s173_s8 = sshll.u32 %s809_s1, 4  ;;  %s174_s8 = int_to_ptr.hbm [resolvable:$true] %s173_s8 }
   0xe   : > { %p735_p10 = pnand %p434_p7, %p161_p8  ;;  %s651_s9 = smov [#allocation2]  }
   0xf   : > { %s175_s10 = sshll.u32 %s651_s9, 4  ;;  %s188_s13 = sshll.u32 %s811_s3, 4  ;;  %s176_s10 = int_to_ptr.vmem [resolvable:$true] %s175_s10  ;;  %s189_s13 = int_to_ptr.hbm [resolvable:$true] %s188_s13 }
  0x10   : > { %p463_p11 = pneg %p735_p10  ;;  %s652_s14 = smov [#allocation5]  }
  0x11   : > { %s190_s15 = sshll.u32 %s652_s14, 4  ;;  %213 = sbr.rel (%p735_p10) target bundleno = 539 (0x21b), region = 40  ;;  %s191_s15 = int_to_ptr.vmem [resolvable:$true] %s190_s15 }
  0x12   : > { %p464_p12 = pnand %p474_p9, %p463_p11 }
  0x14   : > { %466 = dma.hbm_to_vmem [thread:$0]  (!%p464_p12), %s174_s8, 128, %s176_s10, [#allocation3]  }
  0x15   : > { %469 = dma.hbm_to_vmem [thread:$0]  (!%p464_p12), %s189_s13, 128, %s191_s15, [#allocation6]  }
  0x16   : > { %624 = dma.done.wait (%p474_p9), [#allocation3], 128  }
  0x17   : > { %626 = vsyncadd (%p474_p9), [#allocation3], 4294967168 }
  0x18   : > { %628 = dma.done.wait (%p474_p9), [#allocation6], 128  }
  0x19   : > { %630 = vsyncadd (%p474_p9), [#allocation6], 4294967168  ;;  %p246_p13 = scmp.lt.s32.totalorder %s707_s22, 1  ;;  %s653_s30 = smov 127   ;;  %v255_v1 = vld [vmem:[%s810_s2] sm:$0xff]  ;;  %v655_v2 = vmov 0   ;;  %v250_v3 = vlaneseq }
  0x1a   : > { %s654_s6 = smov 1   ;;  %516 = vset.pattern.permute.xlu1 %v655_v2  ;;  %517 = vset.pattern.permute.xlu2 %v655_v2  ;;  %v254_v6 = vld [vmem:[#allocation2] sm:$0xff]  ;;  %vm274_vm2 = vcmask 195584   ;;  %v256_v14 = vld [vmem:[#allocation5] sm:$0xff]  ;;  %s243_s11 = sand.u32 1, %s641_s19   ;;  %vm334_vm3 = vcmask 130048  }
  0x1b   : > { %s247_s16 = scalar_select %p246_p13, %s707_s22, 1  ;;  %271 = vperm.xlu1 %516, %v255_v1   ;;  %518 = vset.pattern.permute.xlu0 %v655_v2  ;;  %v251_v4 = vand.u32 127, %v250_v3  ;;  %v257_v12 = vld [vmem:[%s812_s4] sm:$0xff] }
  0x1c   : > { %s441_s12 = sshll.u32 %s243_s11, 3  ;;  %s450_s13 = sshll.u32 %s707_s22, 3 }
  0x1d   : > { %s442_s17 = sshll.u32 %s247_s16, 3  ;;  %vm253_vm0 = vcmp.le.s32.totalorder %v251_v4, 14  ;;  %vm252_vm1 = vcmp.ge.s32.totalorder %v251_v4, 1  ;;  %s347_s16 = scalar_lea.hbm %s813_s5, %s450_s13 }
  0x1e   : > { %s249_s26 = scalar_lea.vmem %s808_s0, %s442_s17  ;;  %s245_s17 = scalar_lea.vmem [#allocation7], %s441_s12 }
  0x1f   : > { %v258_v0 = vld [vmem:[%s249_s26] sm:$0xff]  ;;  %s349_s23 = sshll.u32 %s245_s17, 4  ;;  %s351_s25 = sshll.u32 %s347_s16, 4  ;;  %s350_s23 = int_to_ptr.vmem [resolvable:$true] %s349_s23  ;;  %s352_s25 = int_to_ptr.hbm [resolvable:$true] %s351_s25 }
  0x20   : > { %264 = vrot.lane.b32.xlu0 %v258_v0, %s653_s30  ;;  %s337_s26 = scalar_lea.sflag [#allocation4], %s243_s11  ;;  %s599_s8 = scalar_lea.hbm %s813_s5, 16 }
  0x28   : > { %259 = vrot.lane.b32.xlu0 %v258_v0, %s654_s6 }
  0x8d   : > { %v272_v8 = vpop.permute.xlu1 %271 }
  0x92   : > { %v265_v5 = vpop.permute.xlu0 %264 }
  0x93   : > { %443 = vmatpush.msk.msra.mxu0 %vm253_vm0, %v265_v5 }
  0x95   : > { %292 = vmatpush.msra.mxu0 %v258_v0 }
  0x9a   : > { %v260_v7 = vpop.permute.xlu0 %259 }
  0x9b   : > { %444 = vmatpush.msk.msra.mxu0 %vm252_vm1, %v260_v7 }
  0x9c   : > { %445 = vmatmul.msk.f32.vlgmr.msra.gmra.mxu0 %vm274_vm2, %v254_v6 }
 0x119   : > { %v295_v9 = vpop.f32.mrf.mxu0 }
 0x11a   : > { %v296_v10 = vadd.f32 %v295_v9, %v272_v8 }
 0x11c   : > { %v298_v11 = vmax.f32 %v296_v10, 0.0 }
 0x11e   : > { %299 = vrot.lane.b32.xlu2 %v298_v11, %s654_s6  ;;  %302 = vrot.lane.b32.xlu1 %v298_v11, %s653_s30  ;;  %s593_s30 = sshra.s32 %s352_s25, 4  ;;  %s594_s30 = int_to_ptr.hbm [resolvable:$true] %s593_s30 }
 0x11f   : > { %s595_s22 = scalar_lea.hbm %s594_s30, 8  ;;  %p600_p3 = scmp.lt.s32.totalorder %s594_s30, %s813_s5 }
 0x120   : > { %p596_p0 = scmp.ne.s32.totalorder %s594_s30, %s595_s22  ;;  %p601_p4 = scmp.lt.s32.totalorder %s599_s8, %s595_s22 }
 0x122   : > { %p597_p1 = pnand %p596_p0, %p724_p5  ;;  %p602_p7 = por %p601_p4, %p600_p3 }
 0x124   : > { %p598_p2 = pneg %p597_p1 }
 0x126   : > { %307 = vperm.xlu2 %517, %v257_v12   ;;  %p603_p8 = pnand %p602_p7, %p598_p2 }
 0x178   : > { %v300_v15 = vpop.permute.xlu2 %299 }
 0x180   : > { %v308_v16 = vpop.permute.xlu2 %307 }
 0x190   : > { %v303_v13 = vpop.permute.xlu1 %302 }
 0x191   : > { %446 = vmatpush.msk.msra.mxu1 %vm253_vm0, %v303_v13 }
 0x193   : > { %327 = vmatpush.msra.mxu1 %v298_v11 }
 0x195   : > { %447 = vmatpush.msk.msra.mxu1 %vm252_vm1, %v300_v15 }
 0x196   : > { %448 = vmatmul.msk.f32.vlgmr.msra.gmra.mxu1 %vm274_vm2, %v256_v14 }
 0x213   : > { %v330_v17 = vpop.f32.mrf.mxu1 }
 0x214   : > { %v331_v18 = vadd.f32 %v330_v17, %v308_v16 }
 0x216   : > { %v333_v19 = vmax.f32 %v331_v18, 0.0 }
 0x218   : > { %335 = vst.msk [vmem:[%s245_s17] sm:$0xff] %vm334_vm3, %v333_v19 }
 0x219   : > { %606 = shalt.err (!%p603_p8)
}
 0x21a   : > { %461 = dma.vmem_to_hbm [thread:$0]  (%p724_p5), %s350_s23, 128, %s352_s25, %s337_s26  }
 0x21b PF: > { %p478_p9 = scmp.ge.s32.totalorder %s649_s21, 2  ;;  %s363_s11 = sand.u32 1, %s637_s18  }
 0x21c   : > { %s364_s12 = scalar_lea.sflag [#allocation4], %s363_s11 }
 0x21d   : > { %p471_p10 = pnand %p478_p9, %p728_p6 }
 0x21f   : > { %p472_p11 = pneg %p471_p10 }
 0x221   : > { %632 = dma.done.wait (%p472_p11), %s364_s12, 128  }
 0x222   : > { %634 = vsyncadd (%p472_p11), %s364_s12, 4294967168  ;;  %p17_p12 = scmp.ge.s32.totalorder %s711_s24, 4   ;;  %s817_s18 = smov %s641_s19 }
 0x223   : > { %s818_s19 = smov %s645_s20  ;;  %s819_s20 = smov %s722_s27 }
 0x224   : > { %s820_s21 = smov %s711_s24  ;;  %19 = sbr.rel (!%p17_p12) target bundleno = 5 (0x5), region = 84 }
 0x229   :  { %370 = vsyncpa [#allocation3], 1 }
 0x22a   :  { %372 = vsyncpa [#allocation3 + $0x1], 1 }
 0x22b   :  { %373 = vsyncpa [#allocation6], 1 }
 0x22c   :  { %374 = vsyncpa [#allocation4], 1 }
 0x22d   :  { %376 = vsyncpa [#allocation4 + $0x1], 1 }

</bundles_post_ra>
